<compile_context>
chip_gen: v6e
topology: v6e:2x2x1
jax: 0.10.0
libtpu: 0.0.40
codegen_flags: <defaults>
</compile_context>

<pallas_src>
import functools

import jax
import jax.numpy as jnp
from jax import lax
from jax.experimental import pallas as pl
from jax.experimental.pallas import tpu as pltpu


def _round_up(x: int, m: int) -> int:
    return (x + m - 1) // m * m


def _clip_loss_kernel(z_ref, y_ref, o_ref, s_acc, diag_acc, *,
                      reduction: str, batch: int):
    k = pl.program_id(0)

    @pl.when(k == 0)
    def _init():
        s_acc[...] = jnp.zeros_like(s_acc)
        diag_acc[...] = jnp.zeros_like(diag_acc)

    z = z_ref[...]                       # (N, tk), native dtype
    y = y_ref[...]                       # (N, tk), native dtype

    # S += Z @ Y^T, contracting the last dim of BOTH operands -> no explicit
    # (N, D)->(D, N) transpose (would cost XLU passes + an extra VMEM copy).
    # f32 inputs use the accurate multi-pass path (matches the f32 torch ref);
    # bf16 inputs stay on the native bf16 MXU path with an f32 accumulator.
    precision = lax.Precision.HIGHEST if z.dtype == jnp.float32 else None
    s_acc[...] += lax.dot_general(
        z, y,
        dimension_numbers=(((1,), (1,)), ((), ())),
        preferred_element_type=jnp.float32,
        precision=precision)

    # diag_i = S[i, i] = <z_i, y_i>: one VPU multiply + row reduce over data
    # already resident in vregs (no iota masks / (N, N) compare-select).
    diag_acc[...] += jnp.sum(
        z.astype(jnp.float32) * y.astype(jnp.float32),
        axis=1, keepdims=True)

    @pl.when(k == pl.num_programs(0) - 1)
    def _epilogue():
        s = s_acc[...]                                        # (N, N) f32
        m = jnp.max(s, axis=1, keepdims=True)                 # (N, 1)
        lse = m + jnp.log(jnp.sum(jnp.exp(s - m), axis=1, keepdims=True))
        loss = lse - diag_acc[...]                            # (N, 1)
        total = jnp.sum(loss)
        if reduction == 'sum':
            o_ref[0, 0] = total
        else:  # 'mean' -- divide by the TRUE batch size, not a padded block
            o_ref[0, 0] = total / jnp.float32(batch)


def _pick_tk(n: int, d: int, itemsize: int,
             vmem_budget: int = 16 * 1024 * 1024) -> int:
    """Contraction tile: a multiple of 128 that divides D, sized so that
    2 inputs x 2 pipeline buffers x (N, tk) plus the (N, N)/(N, 1) f32
    accumulators stay well inside v7x's scoped VMEM."""
    if d % 128 != 0:
        return d                       # block must then equal the full dim
    n_pad = _round_up(max(n, 1), 8)
    acc_bytes = n_pad * _round_up(n, 128) * 4 + n_pad * 128 * 4
    by_vmem = (vmem_budget - acc_bytes) // (4 * n_pad * itemsize)
    by_vmem = max(128, (by_vmem // 128) * 128)
    tk = min(d, 2048, by_vmem)
    while tk > 128 and d % tk != 0:    # keep the grid exact (no ragged block)
        tk -= 128
    return tk


def clip_loss(Y: jax.Array, Z: jax.Array, reduction: str = 'sum') -> jax.Array:
    """Y, Z: (N, F, T). Returns the scalar CLIP loss (float32)."""
    assert Y.shape == Z.shape
    if reduction not in ('sum', 'mean'):
        raise NotImplementedError(reduction)

    N, F, T = Y.shape
    D = F * T
    y2 = Y.reshape(N, D)
    z2 = Z.reshape(N, D)

    itemsize = jnp.dtype(z2.dtype).itemsize
    tk = _pick_tk(N, D, itemsize)
    assert D % tk == 0, (D, tk)
    num_k = D // tk

    kernel = functools.partial(_clip_loss_kernel, reduction=reduction, batch=N)

    # Explicit VMEM budget (2 inputs x 2 pipeline buffers + accumulators),
    # kept under the 32 MiB scoped default of v7x's 64 MiB physical VMEM.
    n_pad = _round_up(N, 8)
    need = (2 * 2 * n_pad * _round_up(tk, 128) * itemsize
            + n_pad * _round_up(N, 128) * 4 + n_pad * 128 * 4)
    vmem_limit = int(min(max(2 * need, 16 * 1024 * 1024), 32 * 1024 * 1024))

    out = pl.pallas_call(
        kernel,
        out_shape=jax.ShapeDtypeStruct((1, 1), jnp.float32),
        grid_spec=pltpu.PrefetchScalarGridSpec(
            num_scalar_prefetch=0,
            grid=(num_k,),
            in_specs=[
                pl.BlockSpec((N, tk), lambda k: (0, k)),   # Z
                pl.BlockSpec((N, tk), lambda k: (0, k)),   # Y
            ],
            # Scalar result lives in SMEM: the natural path for a reduction
            # result instead of an (8,128)-padded VMEM tile writeback.
            out_specs=pl.BlockSpec(memory_space=pltpu.MemorySpace.SMEM),
            scratch_shapes=[
                pltpu.VMEM((N, N), jnp.float32),   # S accumulator
                pltpu.VMEM((N, 1), jnp.float32),   # diag accumulator
            ],
        ),
        compiler_params=pltpu.CompilerParams(
            dimension_semantics=("arbitrary",),
            vmem_limit_bytes=vmem_limit),
    )(z2, y2)
    return out[0, 0]


def _reference_clip_loss(Y, Z, reduction='sum'):
    # Pure-JAX reference mirroring the PyTorch module.
    probs = jnp.einsum('bft,nft->bn', Z, Y, precision=lax.Precision.HIGHEST)
    logp = jax.nn.log_softmax(probs, axis=1)
    N = Y.shape[0]
    targets = jnp.eye(N, dtype=logp.dtype)
    loss = -(targets * logp).sum(axis=1)
    return loss.sum() if reduction == 'sum' else loss.mean()


if __name__ == "__main__":
    key = jax.random.PRNGKey(0)
    k1, k2 = jax.random.split(key)
    N, F, T = 4, 8, 16          # small shapes: batch=4, features=8, time=16
    Y = jax.random.normal(k1, (N, F, T), dtype=jnp.float32)
    Z = jax.random.normal(k2, (N, F, T), dtype=jnp.float32)

    for reduction in ('sum', 'mean'):
        loss = clip_loss(Y, Z, reduction=reduction)
        jax.block_until_ready(loss)
        ref = _reference_clip_loss(Y, Z, reduction=reduction)
        assert jnp.allclose(loss, ref, rtol=1e-4, atol=1e-4), (reduction, loss, ref)

    print("KERNEL_OK")
</pallas_src>

<mosaic_0001>
module attributes {stable_mosaic.version = 11 : i64} {
  func.func @_clip_loss_kernel(%arg0: i32, %arg1: memref<4x128xf32, #tpu.memory_space<vmem>>, %arg2: memref<4x128xf32, #tpu.memory_space<vmem>>, %arg3: memref<1x1xf32, #tpu.memory_space<smem>>, %arg4: memref<4x4xf32, #tpu.memory_space<vmem>>, %arg5: memref<4x1xf32, #tpu.memory_space<vmem>>) attributes {dimension_semantics = [#tpu.dimension_semantics<arbitrary>], iteration_bounds = array<i64: 1>, scalar_prefetch = 0 : i64, scratch_operands = 2 : i64, tpu.core_type = #tpu.core_type<tc>, window_params = [{transform_indices = @transform_0, window_bounds = array<i64: 4, 128>}, {transform_indices = @transform_1, window_bounds = array<i64: 4, 128>}, {transform_indices = @transform_2, window_bounds = array<i64: 1, 1>}]} {
    %c0_i32 = arith.constant 0 : i32
    %0 = arith.cmpi eq, %arg0, %c0_i32 : i32
    %1 = arith.extui %0 : i1 to i32
    %c0_i32_0 = arith.constant 0 : i32
    %2 = arith.cmpi ne, %1, %c0_i32_0 : i32
    scf.if %2 {
      %cst_15 = arith.constant 0.000000e+00 : f32
      %18 = vector.broadcast %cst_15 : f32 to vector<4x4xf32>
      %c0_16 = arith.constant 0 : index
      %c0_17 = arith.constant 0 : index
      %19 = vector.load %arg4[%c0_16, %c0_17] : memref<4x4xf32, #tpu.memory_space<vmem>>, vector<4x4xf32>
      tpu.vector_store %arg4[%c0_16, %c0_17], %18 {strides = array<i32>} : memref<4x4xf32, #tpu.memory_space<vmem>>, vector<4x4xf32>,
      %cst_18 = arith.constant 0.000000e+00 : f32
      %20 = vector.broadcast %cst_18 : f32 to vector<4x1xf32>
      %c0_19 = arith.constant 0 : index
      %c0_20 = arith.constant 0 : index
      %21 = vector.load %arg5[%c0_19, %c0_20] : memref<4x1xf32, #tpu.memory_space<vmem>>, vector<4x1xf32>
      tpu.vector_store %arg5[%c0_19, %c0_20], %20 {strides = array<i32>} : memref<4x1xf32, #tpu.memory_space<vmem>>, vector<4x1xf32>,
    } else {
    }
    %c0 = arith.constant 0 : index
    %c0_1 = arith.constant 0 : index
    %3 = vector.load %arg1[%c0, %c0_1] : memref<4x128xf32, #tpu.memory_space<vmem>>, vector<4x128xf32>
    %c0_2 = arith.constant 0 : index
    %c0_3 = arith.constant 0 : index
    %4 = vector.load %arg2[%c0_2, %c0_3] : memref<4x128xf32, #tpu.memory_space<vmem>>, vector<4x128xf32>
    %c0_4 = arith.constant 0 : index
    %c0_5 = arith.constant 0 : index
    %5 = vector.load %arg4[%c0_4, %c0_5] : memref<4x4xf32, #tpu.memory_space<vmem>>, vector<4x4xf32>
    %cst = arith.constant dense<0.000000e+00> : vector<4x4xf32>
    %6 = tpu.matmul %3, %4, %cst {dimension_numbers = #tpu.dot_dimension_numbers<[1], [1], [0], [0], [0, 0, 1, 0], [], []>, precision = #tpu.contract_precision<fp32>} : vector<4x128xf32>, vector<4x128xf32>, vector<4x4xf32> -> vector<4x4xf32>
    %7 = arith.addf %5, %6 : vector<4x4xf32>
    %c0_6 = arith.constant 0 : index
    %c0_7 = arith.constant 0 : index
    %8 = vector.load %arg4[%c0_6, %c0_7] : memref<4x4xf32, #tpu.memory_space<vmem>>, vector<4x4xf32>
    tpu.vector_store %arg4[%c0_6, %c0_7], %7 {strides = array<i32>} : memref<4x4xf32, #tpu.memory_space<vmem>>, vector<4x4xf32>,
    %c0_8 = arith.constant 0 : index
    %c0_9 = arith.constant 0 : index
    %9 = vector.load %arg5[%c0_8, %c0_9] : memref<4x1xf32, #tpu.memory_space<vmem>>, vector<4x1xf32>
    %10 = arith.mulf %3, %4 : vector<4x128xf32>
    %cst_10 = arith.constant dense<0.000000e+00> : vector<4xf32>
    %11 = vector.multi_reduction <add>, %10, %cst_10 [1] : vector<4x128xf32> to vector<4xf32>
    %12 = vector.shape_cast %11 : vector<4xf32> to vector<4x1xf32>
    %13 = arith.addf %9, %12 : vector<4x1xf32>
    %c0_11 = arith.constant 0 : index
    %c0_12 = arith.constant 0 : index
    %14 = vector.load %arg5[%c0_11, %c0_12] : memref<4x1xf32, #tpu.memory_space<vmem>>, vector<4x1xf32>
    tpu.vector_store %arg5[%c0_11, %c0_12], %13 {strides = array<i32>} : memref<4x1xf32, #tpu.memory_space<vmem>>, vector<4x1xf32>,
    %c0_i32_13 = arith.constant 0 : i32
    %15 = arith.cmpi eq, %arg0, %c0_i32_13 : i32
    %16 = arith.extui %15 : i1 to i32
    %c0_i32_14 = arith.constant 0 : i32
    %17 = arith.cmpi ne, %16, %c0_i32_14 : i32
    scf.if %17 {
      %c0_15 = arith.constant 0 : index
      %c0_16 = arith.constant 0 : index
      %18 = vector.load %arg4[%c0_15, %c0_16] : memref<4x4xf32, #tpu.memory_space<vmem>>, vector<4x4xf32>
      %cst_17 = arith.constant dense<0xFF800000> : vector<4xf32>
      %19 = vector.multi_reduction <maximumf>, %18, %cst_17 [1] : vector<4x4xf32> to vector<4xf32>
      %20 = vector.shape_cast %19 : vector<4xf32> to vector<4x1xf32>
      %21 = vector.broadcast %20 : vector<4x1xf32> to vector<4x4xf32>
      %22 = arith.subf %18, %21 : vector<4x4xf32>
      %23 = math.exp %22 : vector<4x4xf32>
      %cst_18 = arith.constant dense<0.000000e+00> : vector<4xf32>
      %24 = vector.multi_reduction <add>, %23, %cst_18 [1] : vector<4x4xf32> to vector<4xf32>
      %25 = vector.shape_cast %24 : vector<4xf32> to vector<4x1xf32>
      %26 = math.log %25 : vector<4x1xf32>
      %27 = arith.addf %20, %26 : vector<4x1xf32>
      %c0_19 = arith.constant 0 : index
      %c0_20 = arith.constant 0 : index
      %28 = vector.load %arg5[%c0_19, %c0_20] : memref<4x1xf32, #tpu.memory_space<vmem>>, vector<4x1xf32>
      %29 = arith.subf %27, %28 : vector<4x1xf32>
      %30 = vector.shape_cast %29 : vector<4x1xf32> to vector<1x4x1xf32>
      %cst_21 = arith.constant dense<0.000000e+00> : vector<1xf32>
      %31 = vector.multi_reduction <add>, %30, %cst_21 [1, 2] : vector<1x4x1xf32> to vector<1xf32>
      %32 = vector.shape_cast %31 : vector<1xf32> to vector<1x1x1xf32>
      %33 = vector.extract %32[0, 0, 0] : f32 from vector<1x1x1xf32>
      %c0_22 = arith.constant 0 : index
      %c0_23 = arith.constant 0 : index
      %34 = memref.load %arg3[%c0_22, %c0_23] : memref<1x1xf32, #tpu.memory_space<smem>>
      memref.store %33, %arg3[%c0_22, %c0_23] : memref<1x1xf32, #tpu.memory_space<smem>>
    } else {
    }
    return
  }
  func.func @transform_0(%arg0: i32) -> (i32, i32) {
    %c0_i32 = arith.constant 0 : i32
    %c0_i32_0 = arith.constant 0 : i32
    return %c0_i32, %arg0 : i32, i32
  }
  func.func @transform_1(%arg0: i32) -> (i32, i32) {
    %c0_i32 = arith.constant 0 : i32
    %c0_i32_0 = arith.constant 0 : i32
    return %c0_i32, %arg0 : i32, i32
  }
  func.func @transform_2(%arg0: i32) -> (i32, i32) {
    %c0_i32 = arith.constant 0 : i32
    %c0_i32_0 = arith.constant 0 : i32
    %c0_i32_1 = arith.constant 0 : i32
    return %c0_i32, %c0_i32_0 : i32, i32
  }
}

</mosaic_0001>

<bundles_post_ra>
// kernel: tpu_custom_call.1
= control target key start
LH: loop header
LB: loop body
LE: loop exit
PB: predicated region body
PF: predicated region fallthrough
CT: control target
= control target key end

     0   :  { %7 = vsyncpa [#allocation5], 0  ;;  %s710_s0 = inlined_call_operand.hbm [shape: f32[4,128], index: 0, kind: input, shape index: {}]   ;;  %s711_s1 = inlined_call_operand.hbm [shape: f32[4,128], index: 1, kind: input, shape index: {}]   ;;  %s712_s2 = inlined_call_operand.hbm [shape: f32[1,1], index: 2, kind: output, shape index: {}]  }
   0x1   :  { %8 = vsyncpa [#allocation8], 0 }
   0x2   :  { %9 = vsyncpa [#allocation6], 0  ;;  %s657_s9 = smov [#allocation4]   ;;  %s658_s11 = smov [#allocation7]  }
   0x3   :  { %s16_s10 = sshll.u32 %s657_s9, 4  ;;  %s26_s12 = sshll.u32 %s658_s11, 4  ;;  %s17_s10 = int_to_ptr.vmem [resolvable:$true] %s16_s10  ;;  %s27_s12 = int_to_ptr.vmem [resolvable:$true] %s26_s12 }
   0x4   :  { %s611_s13 = scalar_lea.vmem %s17_s10, 64  ;;  %p616_p1 = scmp.lt.s32.totalorder %s17_s10, %s17_s10 }
   0x5   :  { %p612_p0 = scmp.ne.s32.totalorder %s17_s10, %s611_s13  ;;  %p617_p2 = scmp.lt.s32.totalorder %s611_s13, %s611_s13 }
   0x7   :  { %p618_p3 = por %p617_p2, %p616_p1 }
   0x9   :  { %p619_p4 = pnand %p618_p3, %p612_p0 }
   0xb   :  { %622 = shalt.err (!%p619_p4)
}
   0xc   :  { %19 = dma.hbm_to_vmem [thread:$0]  %s710_s0, 64, %s17_s10, [#allocation5]  }
   0xd   :  { %s631_s16 = scalar_lea.vmem %s27_s12, 64  ;;  %p636_p6 = scmp.lt.s32.totalorder %s27_s12, %s27_s12 }
   0xe   :  { %p632_p5 = scmp.ne.s32.totalorder %s27_s12, %s631_s16  ;;  %p637_p7 = scmp.lt.s32.totalorder %s631_s16, %s631_s16 }
  0x10   :  { %p638_p8 = por %p637_p7, %p636_p6 }
  0x12   :  { %p639_p9 = pnand %p638_p8, %p632_p5 }
  0x14   :  { %642 = shalt.err (!%p639_p9)
}
  0x15   :  { %29 = dma.hbm_to_vmem [thread:$0]  %s711_s1, 64, %s27_s12, [#allocation8]  }
  0x16   :  { %651 = dma.done.wait [#allocation5], 64  }
  0x17   :  { %652 = vsyncadd [#allocation5], 4294967232 }
  0x18   :  { %653 = dma.done.wait [#allocation8], 64  }
  0x19   :  { %654 = vsyncadd [#allocation8], 4294967232  ;;  %v659_v0 = vmov 0.0   ;;  %vm660_vm0 = vmmov 0   ;;  %v45_v1 = vld [vmem:[#allocation7] sm:$0xf] }
  0x1a   :  { %562 = vmatprep.subr.mxu0 %v659_v0  ;;  %564 = vmatprep.mubr.msk.f32.mxu0 %vm660_vm0, %v659_v0  ;;  %v44_v2 = vld [vmem:[#allocation4] sm:$0xf]  ;;  %v78_v3 = vand.u32 4294901760, %v45_v1  ;;  %vm40_vm1 = vcmask 27648   ;;  %vm498_vm2 = vcmask 1043456   ;;  %vm42_vm3 = vcmask 3072  }
  0x1b   :  { %567 = vmatprep.subr.mxu1 %v659_v0  ;;  %569 = vmatprep.mubr.msk.f32.mxu1 %vm660_vm0, %v659_v0  ;;  %v113_v4 = vand.u32 4294901760, %v44_v2  ;;  %41 = vst.msk [vmem:[#allocation2] sm:$0xf] %vm40_vm1, %v659_v0  ;;  %v497_v34 = vmul.f32 %v45_v1, %v44_v2  ;;  %s661_s1 = smov [#allocation9]  }
  0x1c   :  { %563 = vmatpush3.xpose.msra.mxu0 %v78_v3  ;;  %v155_v6 = vsub.f32 %v45_v1, %v78_v3  ;;  %43 = vst.msk [vmem:[#allocation3] sm:$0xf] %vm42_vm3, %v659_v0 }
  0x1d   :  { %v114_v5 = vsub.f32 %v44_v2, %v113_v4  ;;  %572 = vmatprep.subr.mxu0 %v659_v0  ;;  %v499_v35 = vsel %vm498_vm2, %v497_v34, 0.0 }
  0x1e   :  { %v156_v8 = vand.u32 4294901760, %v155_v6  ;;  %500 = vadd.xlane.f32.xlu1 %v499_v35 }
  0x1f   :  { %v115_v7 = vand.u32 4294901760, %v114_v5 }
  0x20   :  { %v157_v10 = vsub.f32 %v155_v6, %v156_v8 }
  0x21   :  { %v116_v9 = vsub.f32 %v114_v5, %v115_v7 }
  0x22   :  { %v158_v12 = vand.u32 4294901760, %v157_v10  ;;  %v46_v27 = vld [vmem:[#allocation2] sm:$0xf] }
  0x23   :  { %v117_v11 = vand.u32 4294901760, %v116_v9  ;;  %v496_v42 = vld [vmem:[#allocation3] sm:$0xf] }
  0x24   :  { %568 = vmatpush3.xpose.msra.mxu1 %v158_v12 }
  0x25   :  { %565 = vmatmul.mubr.f32.vlgmr.msra.gmra.mxu0 %v117_v11  ;;  %577 = vmatprep.subr.mxu1 %v659_v0 }
  0x26   :  { %573 = vmatpush3.xpose.msra.mxu0 %v155_v6  ;;  %574 = vmatprep.mubr.msk.f32.mxu0 %vm660_vm0, %v659_v0 }
  0x27   :  { %582 = vmatprep.subr.mxu0 %v659_v0  ;;  %570 = vmatmul.mubr.f32.vlgmr.msra.gmra.mxu1 %v113_v4 }
  0x28   :  { %578 = vmatpush3.xpose.msra.mxu1 %v78_v3  ;;  %579 = vmatprep.mubr.msk.f32.mxu1 %vm660_vm0, %v659_v0 }
  0x29   :  { %575 = vmatmul.mubr.f32.vlgmr.msra.gmra.mxu0 %v114_v5  ;;  %587 = vmatprep.subr.mxu1 %v659_v0 }
  0x2a   :  { %583 = vmatpush3.xpose.msra.mxu0 %v156_v8  ;;  %584 = vmatprep.mubr.msk.f32.mxu0 %vm660_vm0, %v659_v0 }
  0x2b   :  { %580 = vmatmul.mubr.f32.vlgmr.msra.gmra.mxu1 %v115_v7 }
  0x2c   :  { %588 = vmatpush3.xpose.msra.mxu1 %v78_v3  ;;  %589 = vmatprep.mubr.msk.f32.mxu1 %vm660_vm0, %v659_v0 }
  0x2d   :  { %585 = vmatmul.mubr.f32.vlgmr.msra.gmra.mxu0 %v113_v4 }
  0x2f   :  { %590 = vmatmul.mubr.f32.vlgmr.msra.gmra.mxu1 %v113_v4 }
  0xa7   :  { %v501_v41 = vpop.xlane.xlu1 %500 }
  0xa8   :  { %v502_v43 = vadd.f32 %v501_v41, %v496_v42 }
  0xaa   :  { %504 = vst.msk [vmem:[#allocation3] sm:$0xf] %vm42_vm3, %v502_v43 }
  0xb1   :  { %v521_v47 = vld [vmem:[#allocation3] sm:$0xf] }
  0xe5   :  { %v119_v13 = vpop.f32.mrf.mxu0 }
  0xe7   :  { %v566_v14 = vpop.f32.mrf.mxu0  ;;  %v195_v15 = vpop.f32.mrf.mxu1 }
  0xe8   :  { %v196_v16 = vadd.f32 %v195_v15, %v119_v13 }
  0xe9   :  { %v269_v17 = vpop.f32.mrf.mxu0  ;;  %v571_v18 = vpop.f32.mrf.mxu1 }
  0xea   :  { %v270_v19 = vadd.f32 %v269_v17, %v196_v16 }
  0xeb   :  { %v576_v20 = vpop.f32.mrf.mxu0  ;;  %v343_v21 = vpop.f32.mrf.mxu1 }
  0xec   :  { %v344_v22 = vadd.f32 %v343_v21, %v270_v19 }
  0xed   :  { %v417_v23 = vpop.f32.mrf.mxu0  ;;  %v581_v24 = vpop.f32.mrf.mxu1 }
  0xee   :  { %v418_v25 = vadd.f32 %v417_v23, %v344_v22 }
  0xef   :  { %v586_v26 = vpop.f32.mrf.mxu0  ;;  %v489_v28 = vpop.f32.mrf.mxu1 }
  0xf0   :  { %v490_v29 = vadd.f32 %v489_v28, %v418_v25 }
  0xf1   :  { %v591_v30 = vpop.f32.mrf.mxu1 }
  0xf2   :  { %v493_v31 = vadd.f32 %v490_v29, %v46_v27 }
  0xf4   :  { %495 = vst.msk [vmem:[#allocation2] sm:$0xf] %vm40_vm1, %v493_v31 }
  0xfb   :  { %v508_v32 = vld [vmem:[#allocation2] sm:$0xf] }
  0xfc   :  { %v509_v33 = vsel %vm40_vm1, %v508_v32, -inf }
  0xfd   :  { %510 = vmax.xlane.f32.xlu0 %v509_v33 }
 0x186   :  { %v511_v36 = vpop.xlane.xlu0 %510 }
 0x187   :  { %v512_v37 = vsub.f32 %v508_v32, %v511_v36 }
 0x189   :  { %v513_v38 = vmul.f32 1.442695, %v512_v37 }
 0x18b   :  { %599 = vpow2.f32 %v513_v38 }
 0x198   :  { %v600_v39 = vpop.eup %599 }
 0x199   :  { %v515_v40 = vsel %vm40_vm1, %v600_v39, 0.0 }
 0x19a   :  { %516 = vadd.xlane.f32.xlu0 %v515_v40 }
 0x223   :  { %v517_v44 = vpop.xlane.xlu0 %516 }
 0x224   :  { %601 = vlog2.f32 %v517_v44 }
 0x231   :  { %v602_v45 = vpop.eup %601 }
 0x232   :  { %v519_v46 = vmul.f32 0.6931472, %v602_v45 }
 0x234   :  { %v520_v48 = vadd.f32 %v519_v46, %v511_v36 }
 0x236   :  { %v522_v49 = vsub.f32 %v520_v48, %v521_v47 }
 0x238   :  { %v523_v50 = vsel %vm42_vm3, %v522_v49, 0.0 }
 0x239   :  { %524 = vadd.xlane.f32.xlu1 %v523_v50 }
 0x2c2   :  { %v525_v51 = vpop.xlane.xlu1 %524 }
 0x2c3   :  { %v526_v52 = vrot.slane %v525_v51, 4 }
 0x2c5   :  { %v527_v53 = vadd.f32 %v526_v52, %v525_v51 }
 0x2c7   :  { %v528_v54 = vrot.slane %v527_v53, 2 }
 0x2c9   :  { %v529_v55 = vadd.f32 %v528_v54, %v527_v53 }
 0x2cb   :  { %v530_v56 = vrot.slane %v529_v55, 1 }
 0x2cd   :  { %v531_v57 = vadd.f32 %v530_v56, %v529_v55 }
 0x2cf   :  { %592 = vpush %v531_v57 }
 0x300   :  { %s593_s0 = spop %592 }
 0x301   :  { %534 = sst [smem:[#allocation9]] %s593_s0 }
 0x302   :  { %542 = dma.smem_to_hbm %s661_s1, 16, %s712_s2, [#allocation6]  }
 0x303   :  { %655 = dma.done.wait [#allocation6], 16  }
 0x304   :  { %656 = vsyncadd [#allocation6], 4294967280 }
 0x305   :  { %546 = sfence }
 0x306   :  { %547 = vsyncpa [#allocation5], 1 }
 0x307   :  { %548 = vsyncpa [#allocation8], 1 }
 0x308   :  { %549 = vsyncpa [#allocation6], 1 }

</bundles_post_ra>
